<compile_context>
chip_gen: v5e
topology: v5e:2x2
jax: 0.10.0
libtpu: 0.0.40
codegen_flags: <defaults>
</compile_context>

<pallas_src>
import functools

import jax
import jax.numpy as jnp
from jax.experimental import pallas as pl
from jax.experimental.pallas import tpu as pltpu

K = 3      # kernel size (conv and pool)
S = 2      # stride (conv and pool)
LANES = 128


def _out_dim(n):
    # matches PyTorch: floor((n + 2*0 - 1*(K-1) - 1)/S + 1)
    return (n - (K - 1) - 1) // S + 1


def _round_up(n, m):
    return ((n + m - 1) // m) * m


def _im2col_batch_last(x, oh, ow):
    """x: (B, H, W) -> (K*K, oh, ow, B) stride-S valid conv patches, batch on lanes."""
    taps = []
    for di in range(K):
        for dj in range(K):
            taps.append(x[:, di:di + S * (oh - 1) + 1:S, dj:dj + S * (ow - 1) + 1:S])
    p = jnp.stack(taps, axis=0)              # (K*K, B, oh, ow), k = di*K + dj
    return jnp.transpose(p, (0, 2, 3, 1))    # (K*K, oh, ow, B)


def _cnn_kernel(patches_ref, cw_ref, cb_ref, w1_ref, b1_ref, w2_ref, b2_ref,
                out_ref, *, pool_oh, pool_ow):
    # Conv2d(1,1,3,stride=2): 9 scalar-weighted taps accumulated on the VPU.
    # Batch occupies the 128-lane axis -> fully lane-dense vector work.
    acc = cw_ref[0] * patches_ref[0]                          # (conv_oh, conv_ow, TB)
    for k in range(1, K * K):
        acc = acc + cw_ref[k] * patches_ref[k]
    conv = jnp.maximum(acc + cb_ref[0], 0.0)                  # bias + ReLU

    # MaxPool2d(3, stride=2): unrolled over the 9 output positions; contiguous
    # window slices, reduced in registers (no VMEM scratch, no partial-lane stores).
    vals = []
    for i in range(pool_oh):
        for j in range(pool_ow):
            win = conv[S * i:S * i + K, S * j:S * j + K, :]   # (K, K, TB)
            m = jnp.max(win, axis=0)                          # (K, TB)
            m = jnp.max(m, axis=0, keepdims=True)             # (1, TB)
            vals.append(m)
    pooled = jnp.concatenate(vals, axis=0)                    # (pool_oh*pool_ow, TB)

    # Dropout(0.5): identity (eval-mode semantics).
    # TODO(synk): training-mode stochastic dropout mask not reproduced.

    # fc1 + ReLU, fc2 on the MXU with N = batch tile (lane-dense output).
    h1 = jnp.dot(w1_ref[...], pooled, preferred_element_type=jnp.float32)   # (64, TB)
    h1 = jnp.maximum(h1 + b1_ref[...], 0.0)
    out = jnp.dot(w2_ref[...], h1, preferred_element_type=jnp.float32)      # (2, TB)
    out_ref[...] = out + b2_ref[...]


def cnn_forward(x, params, input_height, input_width):
    """x: (B, 1, H, W) float32 (PyTorch NCHW). Returns (B, 2) float32."""
    x = x.reshape(-1, input_height, input_width).astype(jnp.float32)  # squeeze channel
    B = x.shape[0]
    conv_oh, conv_ow = _out_dim(input_height), _out_dim(input_width)
    pool_oh, pool_ow = _out_dim(conv_oh), _out_dim(conv_ow)
    n_pool = pool_oh * pool_ow

    # Batch lives on the lane axis: pad to a multiple of the batch tile.
    tb = min(1024, _round_up(B, LANES))
    b_pad = _round_up(B, tb)
    if b_pad != B:
        x = jnp.pad(x, ((0, b_pad - B), (0, 0), (0, 0)))

    patches = _im2col_batch_last(x, conv_oh, conv_ow)   # (9, conv_oh, conv_ow, b_pad)

    cw = params["conv_w"].reshape(K * K).astype(jnp.float32)   # (9,), k = di*K + dj
    cb = params["conv_b"].reshape(1).astype(jnp.float32)       # (1,)
    w1 = params["fc1_w"].astype(jnp.float32)                   # (64, n_pool)
    b1 = params["fc1_b"].reshape(-1, 1).astype(jnp.float32)    # (64, 1)
    w2 = params["fc2_w"].astype(jnp.float32)                   # (2, 64)
    b2 = params["fc2_b"].reshape(-1, 1).astype(jnp.float32)    # (2, 1)

    kernel = functools.partial(_cnn_kernel, pool_oh=pool_oh, pool_ow=pool_ow)
    smem = pl.BlockSpec(memory_space=pltpu.MemorySpace.SMEM)

    out = pl.pallas_call(
        kernel,
        grid=(b_pad // tb,),
        in_specs=[
            # batch-tiled activations: double-buffered prefetch across grid steps
            pl.BlockSpec((K * K, conv_oh, conv_ow, tb), lambda b: (0, 0, 0, b)),
            smem,                                           # conv weights (9 scalars)
            smem,                                           # conv bias (scalar)
            # weights / biases stay resident across grid steps
            pl.BlockSpec((64, n_pool), lambda b: (0, 0)),
            pl.BlockSpec((64, 1), lambda b: (0, 0)),
            pl.BlockSpec((2, 64), lambda b: (0, 0)),
            pl.BlockSpec((2, 1), lambda b: (0, 0)),
        ],
        out_specs=pl.BlockSpec((2, tb), lambda b: (0, b)),
        out_shape=jax.ShapeDtypeStruct((2, b_pad), jnp.float32),
        compiler_params=pltpu.CompilerParams(
            dimension_semantics=("parallel",),   # shard batch tiles across v7x's 2 TCs
            vmem_limit_bytes=32 * 1024 * 1024,   # safe on v5e/v6e (128 MiB) and v7x (64 MiB)
        ),
    )(patches, cw, cb, w1, b1, w2, b2)

    return out.T[:B]                                        # (B, 2)


def init_params(key, input_height, input_width):
    conv_oh, conv_ow = _out_dim(input_height), _out_dim(input_width)
    pool_oh, pool_ow = _out_dim(conv_oh), _out_dim(conv_ow)
    fc1_in = pool_oh * pool_ow
    ks = jax.random.split(key, 6)

    def u(k, shape, fan_in):
        bound = 1.0 / jnp.sqrt(jnp.float32(fan_in))
        return jax.random.uniform(k, shape, jnp.float32, -bound, bound)

    return {
        "conv_w": u(ks[0], (1, 1, K, K), K * K),
        "conv_b": u(ks[1], (1,), K * K),
        "fc1_w": u(ks[2], (64, fc1_in), fc1_in),
        "fc1_b": u(ks[3], (64,), fc1_in),
        "fc2_w": u(ks[4], (2, 64), 64),
        "fc2_b": u(ks[5], (2,), 64),
    }


if __name__ == "__main__":
    H = W = 16
    B = 2
    key = jax.random.PRNGKey(0)
    pkey, xkey = jax.random.split(key)

    params = init_params(pkey, H, W)
    x = jax.random.normal(xkey, (B, 1, H, W), jnp.float32)   # NCHW like PyTorch

    fwd = jax.jit(cnn_forward, static_argnums=(2, 3))
    out = fwd(x, params, H, W)
    jax.block_until_ready(out)
    assert out.shape == (B, 2) and out.dtype == jnp.float32
    print("KERNEL_OK")
</pallas_src>

<mosaic_0001>
module attributes {stable_mosaic.version = 11 : i64} {
  func.func @_cnn_kernel(%arg0: i32, %arg1: memref<9x7x7x128xf32, #tpu.memory_space<vmem>>, %arg2: memref<9xf32, #tpu.memory_space<smem>>, %arg3: memref<1xf32, #tpu.memory_space<smem>>, %arg4: memref<64x9xf32, #tpu.memory_space<vmem>>, %arg5: memref<64x1xf32, #tpu.memory_space<vmem>>, %arg6: memref<2x64xf32, #tpu.memory_space<vmem>>, %arg7: memref<2x1xf32, #tpu.memory_space<vmem>>, %arg8: memref<2x128xf32, #tpu.memory_space<vmem>>) attributes {dimension_semantics = [#tpu.dimension_semantics<parallel>], iteration_bounds = array<i64: 1>, scalar_prefetch = 0 : i64, scratch_operands = 0 : i64, tpu.core_type = #tpu.core_type<tc>, window_params = [{transform_indices = @transform_0, window_bounds = array<i64: 9, 7, 7, 128>}, {transform_indices = @transform_1, window_bounds = array<i64: 9>}, {transform_indices = @transform_2, window_bounds = array<i64: 1>}, {pipeline_mode = #tpu.pipeline_mode<synchronous>, transform_indices = @transform_3, window_bounds = array<i64: 64, 9>}, {pipeline_mode = #tpu.pipeline_mode<synchronous>, transform_indices = @transform_4, window_bounds = array<i64: 64, 1>}, {pipeline_mode = #tpu.pipeline_mode<synchronous>, transform_indices = @transform_5, window_bounds = array<i64: 2, 64>}, {pipeline_mode = #tpu.pipeline_mode<synchronous>, transform_indices = @transform_6, window_bounds = array<i64: 2, 1>}, {transform_indices = @transform_7, window_bounds = array<i64: 2, 128>}]} {
    %c0 = arith.constant 0 : index
    %0 = memref.load %arg2[%c0] : memref<9xf32, #tpu.memory_space<smem>>
    %c0_0 = arith.constant 0 : index
    %c0_1 = arith.constant 0 : index
    %c0_2 = arith.constant 0 : index
    %c0_3 = arith.constant 0 : index
    %1 = vector.load %arg1[%c0_0, %c0_1, %c0_2, %c0_3] : memref<9x7x7x128xf32, #tpu.memory_space<vmem>>, vector<1x7x7x128xf32>
    %2 = vector.shape_cast %1 : vector<1x7x7x128xf32> to vector<7x7x128xf32>
    %3 = vector.broadcast %0 : f32 to vector<7x7x128xf32>
    %4 = arith.mulf %3, %2 : vector<7x7x128xf32>
    %c1 = arith.constant 1 : index
    %5 = memref.load %arg2[%c1] : memref<9xf32, #tpu.memory_space<smem>>
    %c1_4 = arith.constant 1 : index
    %c0_5 = arith.constant 0 : index
    %c0_6 = arith.constant 0 : index
    %c0_7 = arith.constant 0 : index
    %6 = vector.load %arg1[%c1_4, %c0_5, %c0_6, %c0_7] : memref<9x7x7x128xf32, #tpu.memory_space<vmem>>, vector<1x7x7x128xf32>
    %7 = vector.shape_cast %6 : vector<1x7x7x128xf32> to vector<7x7x128xf32>
    %8 = vector.broadcast %5 : f32 to vector<7x7x128xf32>
    %9 = arith.mulf %8, %7 : vector<7x7x128xf32>
    %10 = arith.addf %4, %9 : vector<7x7x128xf32>
    %c2 = arith.constant 2 : index
    %11 = memref.load %arg2[%c2] : memref<9xf32, #tpu.memory_space<smem>>
    %c2_8 = arith.constant 2 : index
    %c0_9 = arith.constant 0 : index
    %c0_10 = arith.constant 0 : index
    %c0_11 = arith.constant 0 : index
    %12 = vector.load %arg1[%c2_8, %c0_9, %c0_10, %c0_11] : memref<9x7x7x128xf32, #tpu.memory_space<vmem>>, vector<1x7x7x128xf32>
    %13 = vector.shape_cast %12 : vector<1x7x7x128xf32> to vector<7x7x128xf32>
    %14 = vector.broadcast %11 : f32 to vector<7x7x128xf32>
    %15 = arith.mulf %14, %13 : vector<7x7x128xf32>
    %16 = arith.addf %10, %15 : vector<7x7x128xf32>
    %c3 = arith.constant 3 : index
    %17 = memref.load %arg2[%c3] : memref<9xf32, #tpu.memory_space<smem>>
    %c3_12 = arith.constant 3 : index
    %c0_13 = arith.constant 0 : index
    %c0_14 = arith.constant 0 : index
    %c0_15 = arith.constant 0 : index
    %18 = vector.load %arg1[%c3_12, %c0_13, %c0_14, %c0_15] : memref<9x7x7x128xf32, #tpu.memory_space<vmem>>, vector<1x7x7x128xf32>
    %19 = vector.shape_cast %18 : vector<1x7x7x128xf32> to vector<7x7x128xf32>
    %20 = vector.broadcast %17 : f32 to vector<7x7x128xf32>
    %21 = arith.mulf %20, %19 : vector<7x7x128xf32>
    %22 = arith.addf %16, %21 : vector<7x7x128xf32>
    %c4 = arith.constant 4 : index
    %23 = memref.load %arg2[%c4] : memref<9xf32, #tpu.memory_space<smem>>
    %c4_16 = arith.constant 4 : index
    %c0_17 = arith.constant 0 : index
    %c0_18 = arith.constant 0 : index
    %c0_19 = arith.constant 0 : index
    %24 = vector.load %arg1[%c4_16, %c0_17, %c0_18, %c0_19] : memref<9x7x7x128xf32, #tpu.memory_space<vmem>>, vector<1x7x7x128xf32>
    %25 = vector.shape_cast %24 : vector<1x7x7x128xf32> to vector<7x7x128xf32>
    %26 = vector.broadcast %23 : f32 to vector<7x7x128xf32>
    %27 = arith.mulf %26, %25 : vector<7x7x128xf32>
    %28 = arith.addf %22, %27 : vector<7x7x128xf32>
    %c5 = arith.constant 5 : index
    %29 = memref.load %arg2[%c5] : memref<9xf32, #tpu.memory_space<smem>>
    %c5_20 = arith.constant 5 : index
    %c0_21 = arith.constant 0 : index
    %c0_22 = arith.constant 0 : index
    %c0_23 = arith.constant 0 : index
    %30 = vector.load %arg1[%c5_20, %c0_21, %c0_22, %c0_23] : memref<9x7x7x128xf32, #tpu.memory_space<vmem>>, vector<1x7x7x128xf32>
    %31 = vector.shape_cast %30 : vector<1x7x7x128xf32> to vector<7x7x128xf32>
    %32 = vector.broadcast %29 : f32 to vector<7x7x128xf32>
    %33 = arith.mulf %32, %31 : vector<7x7x128xf32>
    %34 = arith.addf %28, %33 : vector<7x7x128xf32>
    %c6 = arith.constant 6 : index
    %35 = memref.load %arg2[%c6] : memref<9xf32, #tpu.memory_space<smem>>
    %c6_24 = arith.constant 6 : index
    %c0_25 = arith.constant 0 : index
    %c0_26 = arith.constant 0 : index
    %c0_27 = arith.constant 0 : index
    %36 = vector.load %arg1[%c6_24, %c0_25, %c0_26, %c0_27] : memref<9x7x7x128xf32, #tpu.memory_space<vmem>>, vector<1x7x7x128xf32>
    %37 = vector.shape_cast %36 : vector<1x7x7x128xf32> to vector<7x7x128xf32>
    %38 = vector.broadcast %35 : f32 to vector<7x7x128xf32>
    %39 = arith.mulf %38, %37 : vector<7x7x128xf32>
    %40 = arith.addf %34, %39 : vector<7x7x128xf32>
    %c7 = arith.constant 7 : index
    %41 = memref.load %arg2[%c7] : memref<9xf32, #tpu.memory_space<smem>>
    %c7_28 = arith.constant 7 : index
    %c0_29 = arith.constant 0 : index
    %c0_30 = arith.constant 0 : index
    %c0_31 = arith.constant 0 : index
    %42 = vector.load %arg1[%c7_28, %c0_29, %c0_30, %c0_31] : memref<9x7x7x128xf32, #tpu.memory_space<vmem>>, vector<1x7x7x128xf32>
    %43 = vector.shape_cast %42 : vector<1x7x7x128xf32> to vector<7x7x128xf32>
    %44 = vector.broadcast %41 : f32 to vector<7x7x128xf32>
    %45 = arith.mulf %44, %43 : vector<7x7x128xf32>
    %46 = arith.addf %40, %45 : vector<7x7x128xf32>
    %c8 = arith.constant 8 : index
    %47 = memref.load %arg2[%c8] : memref<9xf32, #tpu.memory_space<smem>>
    %c8_32 = arith.constant 8 : index
    %c0_33 = arith.constant 0 : index
    %c0_34 = arith.constant 0 : index
    %c0_35 = arith.constant 0 : index
    %48 = vector.load %arg1[%c8_32, %c0_33, %c0_34, %c0_35] : memref<9x7x7x128xf32, #tpu.memory_space<vmem>>, vector<1x7x7x128xf32>
    %49 = vector.shape_cast %48 : vector<1x7x7x128xf32> to vector<7x7x128xf32>
    %50 = vector.broadcast %47 : f32 to vector<7x7x128xf32>
    %51 = arith.mulf %50, %49 : vector<7x7x128xf32>
    %52 = arith.addf %46, %51 : vector<7x7x128xf32>
    %c0_36 = arith.constant 0 : index
    %53 = memref.load %arg3[%c0_36] : memref<1xf32, #tpu.memory_space<smem>>
    %54 = vector.broadcast %53 : f32 to vector<7x7x128xf32>
    %55 = arith.addf %52, %54 : vector<7x7x128xf32>
    %cst = arith.constant 0.000000e+00 : f32
    %56 = vector.broadcast %cst : f32 to vector<7x7x128xf32>
    %57 = arith.maximumf %55, %56 : vector<7x7x128xf32>
    %58 = vector.extract_strided_slice %57 {offsets = [0, 0, 0], sizes = [3, 3, 128], strides = [1, 1, 1]} : vector<7x7x128xf32> to vector<3x3x128xf32>
    %cst_37 = arith.constant dense<0xFF800000> : vector<3x128xf32>
    %59 = vector.multi_reduction <maximumf>, %58, %cst_37 [0] : vector<3x3x128xf32> to vector<3x128xf32>
    %cst_38 = arith.constant dense<0xFF800000> : vector<128xf32>
    %60 = vector.multi_reduction <maximumf>, %59, %cst_38 [0] : vector<3x128xf32> to vector<128xf32>
    %61 = vector.shape_cast %60 : vector<128xf32> to vector<1x128xf32>
    %62 = vector.extract_strided_slice %57 {offsets = [0, 2, 0], sizes = [3, 3, 128], strides = [1, 1, 1]} : vector<7x7x128xf32> to vector<3x3x128xf32>
    %cst_39 = arith.constant dense<0xFF800000> : vector<3x128xf32>
    %63 = vector.multi_reduction <maximumf>, %62, %cst_39 [0] : vector<3x3x128xf32> to vector<3x128xf32>
    %cst_40 = arith.constant dense<0xFF800000> : vector<128xf32>
    %64 = vector.multi_reduction <maximumf>, %63, %cst_40 [0] : vector<3x128xf32> to vector<128xf32>
    %65 = vector.shape_cast %64 : vector<128xf32> to vector<1x128xf32>
    %66 = vector.extract_strided_slice %57 {offsets = [0, 4, 0], sizes = [3, 3, 128], strides = [1, 1, 1]} : vector<7x7x128xf32> to vector<3x3x128xf32>
    %cst_41 = arith.constant dense<0xFF800000> : vector<3x128xf32>
    %67 = vector.multi_reduction <maximumf>, %66, %cst_41 [0] : vector<3x3x128xf32> to vector<3x128xf32>
    %cst_42 = arith.constant dense<0xFF800000> : vector<128xf32>
    %68 = vector.multi_reduction <maximumf>, %67, %cst_42 [0] : vector<3x128xf32> to vector<128xf32>
    %69 = vector.shape_cast %68 : vector<128xf32> to vector<1x128xf32>
    %70 = vector.extract_strided_slice %57 {offsets = [2, 0, 0], sizes = [3, 3, 128], strides = [1, 1, 1]} : vector<7x7x128xf32> to vector<3x3x128xf32>
    %cst_43 = arith.constant dense<0xFF800000> : vector<3x128xf32>
    %71 = vector.multi_reduction <maximumf>, %70, %cst_43 [0] : vector<3x3x128xf32> to vector<3x128xf32>
    %cst_44 = arith.constant dense<0xFF800000> : vector<128xf32>
    %72 = vector.multi_reduction <maximumf>, %71, %cst_44 [0] : vector<3x128xf32> to vector<128xf32>
    %73 = vector.shape_cast %72 : vector<128xf32> to vector<1x128xf32>
    %74 = vector.extract_strided_slice %57 {offsets = [2, 2, 0], sizes = [3, 3, 128], strides = [1, 1, 1]} : vector<7x7x128xf32> to vector<3x3x128xf32>
    %cst_45 = arith.constant dense<0xFF800000> : vector<3x128xf32>
    %75 = vector.multi_reduction <maximumf>, %74, %cst_45 [0] : vector<3x3x128xf32> to vector<3x128xf32>
    %cst_46 = arith.constant dense<0xFF800000> : vector<128xf32>
    %76 = vector.multi_reduction <maximumf>, %75, %cst_46 [0] : vector<3x128xf32> to vector<128xf32>
    %77 = vector.shape_cast %76 : vector<128xf32> to vector<1x128xf32>
    %78 = vector.extract_strided_slice %57 {offsets = [2, 4, 0], sizes = [3, 3, 128], strides = [1, 1, 1]} : vector<7x7x128xf32> to vector<3x3x128xf32>
    %cst_47 = arith.constant dense<0xFF800000> : vector<3x128xf32>
    %79 = vector.multi_reduction <maximumf>, %78, %cst_47 [0] : vector<3x3x128xf32> to vector<3x128xf32>
    %cst_48 = arith.constant dense<0xFF800000> : vector<128xf32>
    %80 = vector.multi_reduction <maximumf>, %79, %cst_48 [0] : vector<3x128xf32> to vector<128xf32>
    %81 = vector.shape_cast %80 : vector<128xf32> to vector<1x128xf32>
    %82 = vector.extract_strided_slice %57 {offsets = [4, 0, 0], sizes = [3, 3, 128], strides = [1, 1, 1]} : vector<7x7x128xf32> to vector<3x3x128xf32>
    %cst_49 = arith.constant dense<0xFF800000> : vector<3x128xf32>
    %83 = vector.multi_reduction <maximumf>, %82, %cst_49 [0] : vector<3x3x128xf32> to vector<3x128xf32>
    %cst_50 = arith.constant dense<0xFF800000> : vector<128xf32>
    %84 = vector.multi_reduction <maximumf>, %83, %cst_50 [0] : vector<3x128xf32> to vector<128xf32>
    %85 = vector.shape_cast %84 : vector<128xf32> to vector<1x128xf32>
    %86 = vector.extract_strided_slice %57 {offsets = [4, 2, 0], sizes = [3, 3, 128], strides = [1, 1, 1]} : vector<7x7x128xf32> to vector<3x3x128xf32>
    %cst_51 = arith.constant dense<0xFF800000> : vector<3x128xf32>
    %87 = vector.multi_reduction <maximumf>, %86, %cst_51 [0] : vector<3x3x128xf32> to vector<3x128xf32>
    %cst_52 = arith.constant dense<0xFF800000> : vector<128xf32>
    %88 = vector.multi_reduction <maximumf>, %87, %cst_52 [0] : vector<3x128xf32> to vector<128xf32>
    %89 = vector.shape_cast %88 : vector<128xf32> to vector<1x128xf32>
    %90 = vector.extract_strided_slice %57 {offsets = [4, 4, 0], sizes = [3, 3, 128], strides = [1, 1, 1]} : vector<7x7x128xf32> to vector<3x3x128xf32>
    %cst_53 = arith.constant dense<0xFF800000> : vector<3x128xf32>
    %91 = vector.multi_reduction <maximumf>, %90, %cst_53 [0] : vector<3x3x128xf32> to vector<3x128xf32>
    %cst_54 = arith.constant dense<0xFF800000> : vector<128xf32>
    %92 = vector.multi_reduction <maximumf>, %91, %cst_54 [0] : vector<3x128xf32> to vector<128xf32>
    %93 = vector.shape_cast %92 : vector<128xf32> to vector<1x128xf32>
    %94 = tpu.concatenate %61, %65, %69, %73, %77, %81, %85, %89, %93 in 0 : vector<1x128xf32>, vector<1x128xf32>, vector<1x128xf32>, vector<1x128xf32>, vector<1x128xf32>, vector<1x128xf32>, vector<1x128xf32>, vector<1x128xf32>, vector<1x128xf32> -> vector<9x128xf32>
    %c0_55 = arith.constant 0 : index
    %c0_56 = arith.constant 0 : index
    %95 = vector.load %arg4[%c0_55, %c0_56] : memref<64x9xf32, #tpu.memory_space<vmem>>, vector<64x9xf32>
    %cst_57 = arith.constant dense<0.000000e+00> : vector<64x128xf32>
    %96 = tpu.matmul %95, %94, %cst_57 {dimension_numbers = #tpu.dot_dimension_numbers<[1], [0], [0], [1], [0, 0, 1, 1], [], []>} : vector<64x9xf32>, vector<9x128xf32>, vector<64x128xf32> -> vector<64x128xf32>
    %c0_58 = arith.constant 0 : index
    %c0_59 = arith.constant 0 : index
    %97 = vector.load %arg5[%c0_58, %c0_59] : memref<64x1xf32, #tpu.memory_space<vmem>>, vector<64x1xf32>
    %98 = vector.broadcast %97 : vector<64x1xf32> to vector<64x128xf32>
    %99 = arith.addf %96, %98 : vector<64x128xf32>
    %cst_60 = arith.constant 0.000000e+00 : f32
    %100 = vector.broadcast %cst_60 : f32 to vector<64x128xf32>
    %101 = arith.maximumf %99, %100 : vector<64x128xf32>
    %c0_61 = arith.constant 0 : index
    %c0_62 = arith.constant 0 : index
    %102 = vector.load %arg6[%c0_61, %c0_62] : memref<2x64xf32, #tpu.memory_space<vmem>>, vector<2x64xf32>
    %cst_63 = arith.constant dense<0.000000e+00> : vector<2x128xf32>
    %103 = tpu.matmul %102, %101, %cst_63 {dimension_numbers = #tpu.dot_dimension_numbers<[1], [0], [0], [1], [0, 0, 1, 1], [], []>} : vector<2x64xf32>, vector<64x128xf32>, vector<2x128xf32> -> vector<2x128xf32>
    %c0_64 = arith.constant 0 : index
    %c0_65 = arith.constant 0 : index
    %104 = vector.load %arg7[%c0_64, %c0_65] : memref<2x1xf32, #tpu.memory_space<vmem>>, vector<2x1xf32>
    %105 = vector.broadcast %104 : vector<2x1xf32> to vector<2x128xf32>
    %106 = arith.addf %103, %105 : vector<2x128xf32>
    %c0_66 = arith.constant 0 : index
    %c0_67 = arith.constant 0 : index
    %107 = vector.load %arg8[%c0_66, %c0_67] : memref<2x128xf32, #tpu.memory_space<vmem>>, vector<2x128xf32>
    tpu.vector_store %arg8[%c0_66, %c0_67], %106 {strides = array<i32>} : memref<2x128xf32, #tpu.memory_space<vmem>>, vector<2x128xf32>,
    return
  }
  func.func @transform_0(%arg0: i32) -> (i32, i32, i32, i32) {
    %c0_i32 = arith.constant 0 : i32
    %c0_i32_0 = arith.constant 0 : i32
    %c0_i32_1 = arith.constant 0 : i32
    %c0_i32_2 = arith.constant 0 : i32
    return %c0_i32, %c0_i32_0, %c0_i32_1, %arg0 : i32, i32, i32, i32
  }
  func.func @transform_1(%arg0: i32) -> i32 {
    %c0_i32 = arith.constant 0 : i32
    %c0_i32_0 = arith.constant 0 : i32
    return %c0_i32 : i32
  }
  func.func @transform_2(%arg0: i32) -> i32 {
    %c0_i32 = arith.constant 0 : i32
    %c0_i32_0 = arith.constant 0 : i32
    return %c0_i32 : i32
  }
  func.func @transform_3(%arg0: i32) -> (i32, i32) {
    %c0_i32 = arith.constant 0 : i32
    %c0_i32_0 = arith.constant 0 : i32
    %c0_i32_1 = arith.constant 0 : i32
    return %c0_i32, %c0_i32_0 : i32, i32
  }
  func.func @transform_4(%arg0: i32) -> (i32, i32) {
    %c0_i32 = arith.constant 0 : i32
    %c0_i32_0 = arith.constant 0 : i32
    %c0_i32_1 = arith.constant 0 : i32
    return %c0_i32, %c0_i32_0 : i32, i32
  }
  func.func @transform_5(%arg0: i32) -> (i32, i32) {
    %c0_i32 = arith.constant 0 : i32
    %c0_i32_0 = arith.constant 0 : i32
    %c0_i32_1 = arith.constant 0 : i32
    return %c0_i32, %c0_i32_0 : i32, i32
  }
  func.func @transform_6(%arg0: i32) -> (i32, i32) {
    %c0_i32 = arith.constant 0 : i32
    %c0_i32_0 = arith.constant 0 : i32
    %c0_i32_1 = arith.constant 0 : i32
    return %c0_i32, %c0_i32_0 : i32, i32
  }
  func.func @transform_7(%arg0: i32) -> (i32, i32) {
    %c0_i32 = arith.constant 0 : i32
    %c0_i32_0 = arith.constant 0 : i32
    return %c0_i32, %arg0 : i32, i32
  }
}

</mosaic_0001>

<bundles_post_ra>
// kernel: cnn_forward.1
= control target key start
LH: loop header
LB: loop body
LE: loop exit
PB: predicated region body
PF: predicated region fallthrough
CT: control target
= control target key end

     0   :  { %13 = vsyncpa [#allocation4], 0  ;;  %s649_s27 = smov [#allocation3]   ;;  %s1027_s0 = inlined_call_operand.vmem [shape: f32[9,7,7,128], index: 0, kind: input, shape index: {}]   ;;  %s1028_s1 = inlined_call_operand.vmem [shape: f32[9], index: 1, kind: input, shape index: {}]   ;;  %s1029_s2 = inlined_call_operand.<no memory space> [shape: f32[1], index: 2, kind: input, shape index: {}]   ;;  %s1030_s3 = inlined_call_operand.vmem [shape: f32[64,9], index: 3, kind: input, shape index: {}]   ;;  %s1031_s4 = inlined_call_operand.vmem [shape: f32[64,1], index: 4, kind: input, shape index: {}]   ;;  %s1032_s5 = inlined_call_operand.vmem [shape: f32[2,64], index: 5, kind: input, shape index: {}]   ;;  %s1033_s6 = inlined_call_operand.vmem [shape: f32[2,1], index: 6, kind: input, shape index: {}]   ;;  %s1034_s7 = inlined_call_operand.vmem [shape: f32[2,128], index: 7, kind: output, shape index: {}]  }
   0x1   :  { %s21_s26 = sshll.u32 %s1028_s1, 4  ;;  %s22_s26 = int_to_ptr.vmem [resolvable:$true] %s21_s26 }
   0x2   :  { %24 = dma.vmem_to_smem %s22_s26, 16, %s649_s27, [#allocation4]  }
   0x3   :  { %647 = dma.done.wait [#allocation4], 16  }
   0x4   :  { %648 = vsyncadd [#allocation4], 4294967280 }
   0x5   :  { %39 = sfence }
   0x6   :  { %s40_s28 = sld [smem:[#allocation3]]  ;;  %v41_v0 = vld [vmem:[%s1027_s0] sm:$0x7f]  ;;  %v42_v1 = vld [vmem:[%s1027_s0 + $0x8] sm:$0x7f]  ;;  %v757_v34 = vstv %s1029_s2  ;;  %vm264_vm0 = vcmask 1042432  }
   0x7   :  { %s552_s29 = sld [smem:[#allocation3 + $0x1]]  ;;  %v43_v2 = vld [vmem:[%s1027_s0 + $0x10] sm:$0x7f]  ;;  %v44_v3 = vld [vmem:[%s1027_s0 + $0x18] sm:$0x7f]  ;;  %vm277_vm1 = vcmask 1044482  }
   0x8   :  { %v45_v4 = vld [vmem:[%s1027_s0 + $0x20] sm:$0x7f]  ;;  %v46_v5 = vld [vmem:[%s1027_s0 + $0x28] sm:$0x7f]  ;;  %v47_v6 = vld [vmem:[%s1027_s0 + $0x30] sm:$0x7f] }
   0x9   :  { %v553_v7 = vld [vmem:[%s1027_s0 + $0x38] sm:$0x7f]  ;;  %s718_s22 = sld [smem:[#allocation3 + $0x2]]  ;;  %v554_v9 = vld [vmem:[%s1027_s0 + $0x40] sm:$0x7f]  ;;  %vm290_vm2 = vcmask 1046532  }
   0xa   :  { %v555_v10 = vld [vmem:[%s1027_s0 + $0x48] sm:$0x7f]  ;;  %v556_v11 = vld [vmem:[%s1027_s0 + $0x50] sm:$0x7f]  ;;  %v557_v16 = vld [vmem:[%s1027_s0 + $0x58] sm:$0x7f] }
   0xb   :  { %v558_v17 = vld [vmem:[%s1027_s0 + $0x60] sm:$0x7f]  ;;  %v559_v18 = vld [vmem:[%s1027_s0 + $0x68] sm:$0x7f]  ;;  %s738_s1 = sld [smem:[#allocation3 + $0x3]]  ;;  %vm369_vm3 = vcmask 1040384  }
   0xc   :  { %v48_v8 = vstv %s40_s28  ;;  %v561_v27 = vld [vmem:[%s1027_s0 + $0x70] sm:$0x7f]  ;;  %v562_v28 = vld [vmem:[%s1027_s0 + $0x78] sm:$0x7f]  ;;  %v563_v32 = vld [vmem:[%s1027_s0 + $0x80] sm:$0x7f] }
   0xd   :  { %v49_v12 = vmul.f32 %v48_v8, %v41_v0  ;;  %v50_v13 = vmul.f32 %v48_v8, %v42_v1  ;;  %v51_v14 = vmul.f32 %v48_v8, %v43_v2  ;;  %v52_v15 = vmul.f32 %v48_v8, %v44_v3  ;;  %v564_v33 = vld [vmem:[%s1027_s0 + $0x88] sm:$0x7f]  ;;  %s752_s20 = sld [smem:[#allocation3 + $0x4]]  ;;  %v565_v39 = vld [vmem:[%s1027_s0 + $0x90] sm:$0x7f] }
   0xe   :  { %v53_v19 = vmul.f32 %v48_v8, %v45_v4  ;;  %v54_v20 = vmul.f32 %v48_v8, %v46_v5  ;;  %v55_v21 = vmul.f32 %v48_v8, %v47_v6  ;;  %v65_v22 = vstv %s552_s29  ;;  %v566_v40 = vld [vmem:[%s1027_s0 + $0x98] sm:$0x7f]  ;;  %v567_v41 = vld [vmem:[%s1027_s0 + $0xa0] sm:$0x7f]  ;;  %v569_v50 = vld [vmem:[%s1027_s0 + $0xa8] sm:$0x7f] }
   0xf   :  { %v66_v23 = vmul.f32 %v553_v7, %v65_v22  ;;  %v67_v24 = vmul.f32 %v554_v9, %v65_v22  ;;  %v68_v25 = vmul.f32 %v555_v10, %v65_v22  ;;  %v69_v26 = vmul.f32 %v556_v11, %v65_v22  ;;  %v570_v51 = vld [vmem:[%s1027_s0 + $0xb0] sm:$0x7f]  ;;  %v571_v52 = vld [vmem:[%s1027_s0 + $0xb8] sm:$0x7f]  ;;  %v572_v56 = vld [vmem:[%s1027_s0 + $0xc0] sm:$0x7f] }
  0x10   :  { %v70_v29 = vmul.f32 %v557_v16, %v65_v22  ;;  %v71_v30 = vmul.f32 %v558_v17, %v65_v22  ;;  %v72_v31 = vmul.f32 %v559_v18, %v65_v22  ;;  %v89_v45 = vstv %s718_s22  ;;  %v573_v57 = vld [vmem:[%s1027_s0 + $0xc8] sm:$0x7f]  ;;  %s785_s16 = sld [smem:[#allocation3 + $0x5]]  ;;  %v574_v63 = vld [vmem:[%s1027_s0 + $0xd0] sm:$0x7f] }
  0x11   :  { %v73_v35 = vadd.f32 %v66_v23, %v49_v12  ;;  %v74_v36 = vadd.f32 %v67_v24, %v50_v13  ;;  %v75_v37 = vadd.f32 %v68_v25, %v51_v14  ;;  %v76_v38 = vadd.f32 %v69_v26, %v52_v15  ;;  %v575_v0 = vld [vmem:[%s1027_s0 + $0xd8] sm:$0x7f]  ;;  %v577_v5 = vld [vmem:[%s1027_s0 + $0xe0] sm:$0x7f]  ;;  %v578_v10 = vld [vmem:[%s1027_s0 + $0xe8] sm:$0x7f] }
  0x12   :  { %v77_v42 = vadd.f32 %v70_v29, %v53_v19  ;;  %v78_v43 = vadd.f32 %v71_v30, %v54_v20  ;;  %v79_v44 = vadd.f32 %v72_v31, %v55_v21  ;;  %v90_v46 = vmul.f32 %v561_v27, %v89_v45  ;;  %v579_v11 = vld [vmem:[%s1027_s0 + $0xf0] sm:$0x7f]  ;;  %v580_v12 = vld [vmem:[%s1027_s0 + $0xf8] sm:$0x7f]  ;;  %v581_v16 = vld [vmem:[%s1027_s0 + $0x100] sm:$0x7f] }
  0x13   :  { %v91_v47 = vmul.f32 %v562_v28, %v89_v45  ;;  %v92_v48 = vmul.f32 %v563_v32, %v89_v45  ;;  %v93_v49 = vmul.f32 %v564_v33, %v89_v45  ;;  %v94_v53 = vmul.f32 %v565_v39, %v89_v45  ;;  %v582_v17 = vld [vmem:[%s1027_s0 + $0x108] sm:$0x7f]  ;;  %s812_s10 = sld [smem:[#allocation3 + $0x6]]  ;;  %v583_v23 = vld [vmem:[%s1027_s0 + $0x110] sm:$0x7f] }
  0x14   :  { %v95_v54 = vmul.f32 %v566_v40, %v89_v45  ;;  %v96_v55 = vmul.f32 %v567_v41, %v89_v45  ;;  %v113_v58 = vstv %s738_s1  ;;  %v97_v59 = vadd.f32 %v90_v46, %v73_v35  ;;  %v585_v28 = vld [vmem:[%s1027_s0 + $0x118] sm:$0x7f]  ;;  %v586_v29 = vld [vmem:[%s1027_s0 + $0x120] sm:$0x7f]  ;;  %v587_v35 = vld [vmem:[%s1027_s0 + $0x128] sm:$0x7f] }
  0x15   :  { %v98_v60 = vadd.f32 %v91_v47, %v74_v36  ;;  %v99_v61 = vadd.f32 %v92_v48, %v75_v37  ;;  %v100_v62 = vadd.f32 %v93_v49, %v76_v38  ;;  %v101_v1 = vadd.f32 %v94_v53, %v77_v42  ;;  %v588_v36 = vld [vmem:[%s1027_s0 + $0x130] sm:$0x7f]  ;;  %s829_s19 = sld [smem:[#allocation3 + $0x7]]  ;;  %v589_v40 = vld [vmem:[%s1027_s0 + $0x138] sm:$0x7f] }
  0x16   :  { %v102_v2 = vadd.f32 %v95_v54, %v78_v43  ;;  %v103_v3 = vadd.f32 %v96_v55, %v79_v44  ;;  %v114_v4 = vmul.f32 %v569_v50, %v113_v58  ;;  %v115_v6 = vmul.f32 %v570_v51, %v113_v58  ;;  %v590_v41 = vld [vmem:[%s1027_s0 + $0x140] sm:$0x7f]  ;;  %v591_v42 = vld [vmem:[%s1027_s0 + $0x148] sm:$0x7f]  ;;  %v594_v53 = vld [vmem:[%s1027_s0 + $0x158] sm:$0x7f] }
  0x17   :  { %v116_v7 = vmul.f32 %v571_v52, %v113_v58  ;;  %v117_v8 = vmul.f32 %v572_v56, %v113_v58  ;;  %v118_v9 = vmul.f32 %v573_v57, %v113_v58  ;;  %v119_v13 = vmul.f32 %v574_v63, %v113_v58  ;;  %v593_v52 = vld [vmem:[%s1027_s0 + $0x150] sm:$0x7f]  ;;  %s853_s12 = sld [smem:[#allocation3 + $0x8]] }
  0x18   :  { %v120_v14 = vmul.f32 %v575_v0, %v113_v58  ;;  %v121_v15 = vadd.f32 %v114_v4, %v97_v59  ;;  %v137_v18 = vstv %s752_s20  ;;  %v122_v19 = vadd.f32 %v115_v6, %v98_v60  ;;  %v595_v58 = vld [vmem:[%s1027_s0 + $0x160] sm:$0x7f]  ;;  %v596_v59 = vld [vmem:[%s1027_s0 + $0x168] sm:$0x7f]  ;;  %v597_v63 = vld [vmem:[%s1027_s0 + $0x170] sm:$0x7f] }
  0x19   :  { %v123_v20 = vadd.f32 %v116_v7, %v99_v61  ;;  %v124_v21 = vadd.f32 %v117_v8, %v100_v62  ;;  %v125_v22 = vadd.f32 %v118_v9, %v101_v1  ;;  %v126_v24 = vadd.f32 %v119_v13, %v102_v2  ;;  %v598_v0 = vld [vmem:[%s1027_s0 + $0x178] sm:$0x7f]  ;;  %v599_v1 = vld [vmem:[%s1027_s0 + $0x180] sm:$0x7f] }
  0x1a   :  { %v127_v25 = vadd.f32 %v120_v14, %v103_v3  ;;  %v138_v26 = vmul.f32 %v577_v5, %v137_v18  ;;  %v139_v27 = vmul.f32 %v578_v10, %v137_v18  ;;  %v140_v30 = vmul.f32 %v579_v11, %v137_v18  ;;  %v601_v11 = vld [vmem:[%s1027_s0 + $0x188] sm:$0x7f] }
  0x1b   :  { %v141_v31 = vmul.f32 %v580_v12, %v137_v18  ;;  %v142_v32 = vmul.f32 %v581_v16, %v137_v18  ;;  %v143_v33 = vmul.f32 %v582_v17, %v137_v18  ;;  %v144_v37 = vmul.f32 %v583_v23, %v137_v18  ;;  %v602_v12 = vld [vmem:[%s1027_s0 + $0x190] sm:$0x7f]  ;;  %v603_v16 = vld [vmem:[%s1027_s0 + $0x198] sm:$0x7f]  ;;  %v604_v17 = vld [vmem:[%s1027_s0 + $0x1a0] sm:$0x7f] }
  0x1c   :  { %v145_v38 = vadd.f32 %v138_v26, %v121_v15  ;;  %v146_v39 = vadd.f32 %v139_v27, %v122_v19  ;;  %v161_v43 = vstv %s785_s16  ;;  %v147_v44 = vadd.f32 %v140_v30, %v123_v20  ;;  %v605_v18 = vld [vmem:[%s1027_s0 + $0x1a8] sm:$0x7f] }
  0x1d   :  { %v148_v45 = vadd.f32 %v141_v31, %v124_v21  ;;  %v149_v46 = vadd.f32 %v142_v32, %v125_v22  ;;  %v150_v47 = vadd.f32 %v143_v33, %v126_v24  ;;  %v151_v48 = vadd.f32 %v144_v37, %v127_v25  ;;  %v606_v24 = vld [vmem:[%s1027_s0 + $0x1b0] sm:$0x7f]  ;;  %v607_v25 = vld [vmem:[%s1027_s0 + $0x1b8] sm:$0x7f] }
  0x1e   :  { %v162_v49 = vmul.f32 %v585_v28, %v161_v43  ;;  %v163_v50 = vmul.f32 %v586_v29, %v161_v43  ;;  %v164_v51 = vmul.f32 %v587_v35, %v161_v43  ;;  %v165_v54 = vmul.f32 %v588_v36, %v161_v43  ;;  %v609_v35 = vld [vmem:[%s1027_s0 + $0x1c0] sm:$0x7f]  ;;  %v610_v36 = vld [vmem:[%s1027_s0 + $0x1c8] sm:$0x7f]  ;;  %v611_v37 = vld [vmem:[%s1027_s0 + $0x1d0] sm:$0x7f] }
  0x1f   :  { %v166_v55 = vmul.f32 %v589_v40, %v161_v43  ;;  %v167_v56 = vmul.f32 %v590_v41, %v161_v43  ;;  %v168_v57 = vmul.f32 %v591_v42, %v161_v43  ;;  %v185_v2 = vstv %s812_s10  ;;  %v612_v41 = vld [vmem:[%s1027_s0 + $0x1d8] sm:$0x7f]  ;;  %v613_v42 = vld [vmem:[%s1027_s0 + $0x1e0] sm:$0x7f]  ;;  %v614_v43 = vld [vmem:[%s1027_s0 + $0x1e8] sm:$0x7f] }
  0x20   :  { %v169_v60 = vadd.f32 %v162_v49, %v145_v38  ;;  %v170_v61 = vadd.f32 %v163_v50, %v146_v39  ;;  %v171_v62 = vadd.f32 %v164_v51, %v147_v44  ;;  %v172_v3 = vadd.f32 %v165_v54, %v148_v45  ;;  %v615_v49 = vld [vmem:[%s1027_s0 + $0x1f0] sm:$0x7f] }
  0x21   :  { %v173_v4 = vadd.f32 %v166_v55, %v149_v46  ;;  %v174_v5 = vadd.f32 %v167_v56, %v150_v47  ;;  %v175_v6 = vadd.f32 %v168_v57, %v151_v48  ;;  %v186_v7 = vmul.f32 %v593_v52, %v185_v2 }
  0x22   :  { %v187_v8 = vmul.f32 %v594_v53, %v185_v2  ;;  %v188_v9 = vmul.f32 %v595_v58, %v185_v2  ;;  %v189_v10 = vmul.f32 %v596_v59, %v185_v2  ;;  %v190_v13 = vmul.f32 %v597_v63, %v185_v2 }
  0x23   :  { %v191_v14 = vmul.f32 %v598_v0, %v185_v2  ;;  %v192_v15 = vmul.f32 %v599_v1, %v185_v2  ;;  %v209_v19 = vstv %s829_s19  ;;  %v193_v20 = vadd.f32 %v186_v7, %v169_v60 }
  0x24   :  { %v194_v21 = vadd.f32 %v187_v8, %v170_v61  ;;  %v195_v22 = vadd.f32 %v188_v9, %v171_v62  ;;  %v196_v23 = vadd.f32 %v189_v10, %v172_v3  ;;  %v197_v26 = vadd.f32 %v190_v13, %v173_v4 }
  0x25   :  { %v198_v27 = vadd.f32 %v191_v14, %v174_v5  ;;  %v199_v28 = vadd.f32 %v192_v15, %v175_v6  ;;  %v210_v29 = vmul.f32 %v601_v11, %v209_v19  ;;  %v211_v30 = vmul.f32 %v602_v12, %v209_v19 }
  0x26   :  { %v212_v31 = vmul.f32 %v603_v16, %v209_v19  ;;  %v213_v32 = vmul.f32 %v604_v17, %v209_v19  ;;  %v214_v33 = vmul.f32 %v605_v18, %v209_v19  ;;  %v215_v38 = vmul.f32 %v606_v24, %v209_v19 }
  0x27   :  { %v216_v39 = vmul.f32 %v607_v25, %v209_v19  ;;  %v217_v40 = vadd.f32 %v210_v29, %v193_v20  ;;  %v233_v44 = vstv %s853_s12  ;;  %v218_v45 = vadd.f32 %v211_v30, %v194_v21 }
  0x28   :  { %v219_v46 = vadd.f32 %v212_v31, %v195_v22  ;;  %v220_v47 = vadd.f32 %v213_v32, %v196_v23  ;;  %v221_v48 = vadd.f32 %v214_v33, %v197_v26  ;;  %v222_v50 = vadd.f32 %v215_v38, %v198_v27 }
  0x29   :  { %v223_v51 = vadd.f32 %v216_v39, %v199_v28  ;;  %v234_v52 = vmul.f32 %v609_v35, %v233_v44  ;;  %v235_v53 = vmul.f32 %v610_v36, %v233_v44  ;;  %v236_v54 = vmul.f32 %v611_v37, %v233_v44 }
  0x2a   :  { %v237_v55 = vmul.f32 %v612_v41, %v233_v44  ;;  %v238_v56 = vmul.f32 %v613_v42, %v233_v44  ;;  %v239_v57 = vmul.f32 %v614_v43, %v233_v44  ;;  %v240_v58 = vmul.f32 %v615_v49, %v233_v44 }
  0x2b   :  { %v241_v59 = vadd.f32 %v234_v52, %v217_v40  ;;  %v242_v60 = vadd.f32 %v235_v53, %v218_v45  ;;  %v243_v61 = vadd.f32 %v236_v54, %v219_v46  ;;  %vm371_vm4 = vcmask 1041408  }
  0x2c   :  { %v244_v62 = vadd.f32 %v237_v55, %v220_v47  ;;  %v245_v63 = vadd.f32 %v238_v56, %v221_v48  ;;  %v246_v0 = vadd.f32 %v239_v57, %v222_v50  ;;  %v247_v1 = vadd.f32 %v240_v58, %v223_v51 }
  0x2d   :  { %v250_v2 = vadd.f32 %v757_v34, %v241_v59  ;;  %v251_v3 = vadd.f32 %v757_v34, %v242_v60  ;;  %v252_v4 = vadd.f32 %v757_v34, %v243_v61  ;;  %vm374_vm5 = vcmask 1043456  }
  0x2e   :  { %v253_v5 = vadd.f32 %v757_v34, %v244_v62  ;;  %v254_v6 = vadd.f32 %v757_v34, %v245_v63  ;;  %v255_v7 = vadd.f32 %v757_v34, %v246_v0  ;;  %v256_v8 = vadd.f32 %v757_v34, %v247_v1 }
  0x2f   :  { %v257_v9 = vmax.f32 %v250_v2, 0.0  ;;  %v258_v10 = vmax.f32 %v251_v3, 0.0  ;;  %v259_v11 = vmax.f32 %v252_v4, 0.0  ;;  %vm376_vm6 = vcmask 1044480  }
  0x30   :  { %v260_v12 = vmax.f32 %v253_v5, 0.0  ;;  %v261_v13 = vmax.f32 %v254_v6, 0.0  ;;  %v916_v14 = vmax.f32 %v255_v7, 0.0  ;;  %v918_v15 = vmax.f32 %v256_v8, 0.0 }
  0x31   :  { %v265_v16 = vsel %vm264_vm0, %v257_v9, -inf  ;;  %v266_v17 = vsel %vm264_vm0, %v258_v10, -inf  ;;  %v278_v18 = vsel %vm277_vm1, %v257_v9, -inf  ;;  %v267_v19 = vsel %vm264_vm0, %v259_v11, -inf }
  0x32   :  { %v268_v20 = vmax.f32 %v265_v16, %v266_v17  ;;  %v279_v34 = vsel %vm277_vm1, %v258_v10, -inf  ;;  %v280_v21 = vsel %vm277_vm1, %v259_v11, -inf  ;;  %v291_v23 = vsel %vm290_vm2, %v257_v9, -inf }
  0x33   :  { %v281_v22 = vmax.f32 %v278_v18, %v279_v34  ;;  %v292_v24 = vsel %vm290_vm2, %v258_v10, -inf  ;;  %v293_v25 = vsel %vm290_vm2, %v259_v11, -inf  ;;  %v303_v28 = vsel %vm264_vm0, %v260_v12, -inf }
  0x34   :  { %v269_v26 = vmax.f32 %v268_v20, %v267_v19  ;;  %v294_v27 = vmax.f32 %v291_v23, %v292_v24  ;;  %v325_v29 = vsel %vm290_vm2, %v260_v12, -inf  ;;  %v305_v31 = vmax.f32 %v267_v19, %v303_v28 }
  0x35   :  { %v282_v30 = vmax.f32 %v281_v22, %v280_v21  ;;  %v326_v32 = vsel %vm290_vm2, %v261_v13, -inf  ;;  %v327_v33 = vmax.f32 %v293_v25, %v325_v29  ;;  %v358_v37 = vsel %vm290_vm2, %v916_v14, -inf }
  0x36   :  { %v270_v35 = vsel %vm264_vm0, %v269_v26, -inf  ;;  %v295_v36 = vmax.f32 %v294_v27, %v293_v25  ;;  %v359_v38 = vsel %vm290_vm2, %v918_v15, -inf  ;;  %v360_v41 = vmax.f32 %v326_v32, %v358_v37 }
  0x37   :  { %v271_v39 = vrot.slane %v270_v35, 4  ;;  %v283_v40 = vsel %vm277_vm1, %v282_v30, -inf  ;;  %v328_v44 = vmax.f32 %v327_v33, %v326_v32  ;;  %v304_v48 = vsel %vm264_vm0, %v261_v13, -inf }
  0x38   :  { %v284_v42 = vrot.slane %v283_v40, 4  ;;  %v296_v43 = vsel %vm290_vm2, %v295_v36, -inf  ;;  %v361_v47 = vmax.f32 %v360_v41, %v359_v38  ;;  %v306_v50 = vmax.f32 %v305_v31, %v304_v48 }
  0x39   :  { %v272_v45 = vmax.f32 %v270_v35, %v271_v39  ;;  %v297_v46 = vrot.slane %v296_v43, 4  ;;  %v314_v51 = vsel %vm277_vm1, %v260_v12, -inf  ;;  %v315_v52 = vsel %vm277_vm1, %v261_v13, -inf }
  0x3a   :  { %v285_v49 = vmax.f32 %v283_v40, %v284_v42  ;;  %v362_v55 = vsel %vm290_vm2, %v361_v47, -inf  ;;  %v316_v56 = vmax.f32 %v280_v21, %v314_v51  ;;  %v307_v59 = vsel %vm264_vm0, %v306_v50, -inf  ;;  %v393_v50 = vld [vmem:[%s1031_s4 + $0x18] sm:$0xff] }
  0x3b   :  { %v273_v53 = vrot.slane %v272_v45, 2  ;;  %v298_v54 = vmax.f32 %v296_v43, %v297_v46  ;;  %v363_v58 = vrot.slane %v362_v55, 4  ;;  %v329_v60 = vsel %vm290_vm2, %v328_v44, -inf  ;;  %v395_v43 = vld [vmem:[%s1031_s4 + $0x28] sm:$0xff] }
  0x3c   :  { %v286_v57 = vrot.slane %v285_v49, 2  ;;  %v308_v63 = vrot.slane %v307_v59, 4  ;;  %v317_v0 = vmax.f32 %v316_v56, %v315_v52  ;;  %v330_v3 = vrot.slane %v329_v60, 4 }
  0x3d   :  { %v274_v61 = vmax.f32 %v272_v45, %v273_v53  ;;  %v299_v62 = vrot.slane %v298_v54, 2  ;;  %v364_v2 = vmax.f32 %v362_v55, %v363_v58  ;;  %v336_v4 = vsel %vm264_vm0, %v916_v14, -inf }
  0x3e   :  { %v287_v1 = vmax.f32 %v285_v49, %v286_v57  ;;  %v309_v7 = vmax.f32 %v307_v59, %v308_v63  ;;  %v318_v8 = vsel %vm277_vm1, %v317_v0, -inf  ;;  %v331_v12 = vmax.f32 %v329_v60, %v330_v3  ;;  %v396_v60 = vld [vmem:[%s1031_s4 + $0x30] sm:$0xff]  ;;  %v385_v3 = vld [vmem:[%s1030_s3 + $0x18] sm:$0xff] }
  0x3f   :  { %v275_v5 = vrot.slane %v274_v61, 1  ;;  %v300_v6 = vmax.f32 %v298_v54, %v299_v62  ;;  %v365_v10 = vrot.slane %v364_v2, 2  ;;  %v319_v11 = vrot.slane %v318_v8, 4  ;;  %v392_v0 = vld [vmem:[%s1031_s4 + $0x10] sm:$0xff] }
  0x40   :  { %v288_v9 = vrot.slane %v287_v1, 1  ;;  %v310_v17 = vrot.slane %v309_v7, 2  ;;  %v337_v18 = vsel %vm264_vm0, %v918_v15, -inf  ;;  %v332_v21 = vrot.slane %v331_v12, 2 }
  0x41   :  { %v276_v13 = vmax.f32 %v274_v61, %v275_v5  ;;  %v301_v16 = vrot.slane %v300_v6, 1  ;;  %v366_v20 = vmax.f32 %v364_v2, %v365_v10  ;;  %v320_v34 = vmax.f32 %v318_v8, %v319_v11  ;;  %v394_v61 = vld [vmem:[%s1031_s4 + $0x20] sm:$0xff]  ;;  %v389_v11 = vld [vmem:[%s1030_s3 + $0x38] sm:$0xff] }
  0x42   :  { %v289_v19 = vmax.f32 %v287_v1, %v288_v9  ;;  %v311_v22 = vmax.f32 %v309_v7, %v310_v17  ;;  %v338_v23 = vmax.f32 %v304_v48, %v336_v4  ;;  %v347_v24 = vsel %vm277_vm1, %v916_v14, -inf  ;;  %v388_v4 = vld [vmem:[%s1030_s3 + $0x30] sm:$0xff]  ;;  %v391_v7 = vld [vmem:[%s1031_s4 + $0x8] sm:$0xff]  ;;  %v390_v8 = vld [vmem:[%s1031_s4] sm:$0xff] }
  0x43   :  { %v302_v25 = vmax.f32 %v300_v6, %v301_v16  ;;  %v367_v26 = vrot.slane %v366_v20, 1  ;;  %v321_v28 = vrot.slane %v320_v34, 2  ;;  %v333_v30 = vmax.f32 %v331_v12, %v332_v21  ;;  %v382_v6 = vld [vmem:[%s1030_s3] sm:$0xff]  ;;  %v383_v12 = vld [vmem:[%s1030_s3 + $0x8] sm:$0xff]  ;;  %v384_v16 = vld [vmem:[%s1030_s3 + $0x10] sm:$0xff] }
  0x44   :  { %v370_v27 = vsel %vm369_vm3, %v276_v13, %v289_v19  ;;  %v312_v29 = vrot.slane %v311_v22, 1  ;;  %v339_v31 = vmax.f32 %v338_v23, %v337_v18  ;;  %v348_v32 = vsel %vm277_vm1, %v918_v15, -inf  ;;  %v397_v15 = vld [vmem:[%s1031_s4 + $0x38] sm:$0xff]  ;;  %v516_v9 = vld [vmem:[%s1033_s6] sm:$0x3]  ;;  %v387_v13 = vld [vmem:[%s1030_s3 + $0x28] sm:$0xff] }
  0x45   :  { %v368_v33 = vmax.f32 %v366_v20, %v367_v26  ;;  %v322_v35 = vmax.f32 %v320_v34, %v321_v28  ;;  %v349_v36 = vmax.f32 %v315_v52, %v347_v24  ;;  %v372_v39 = vsel %vm371_vm4, %v370_v27, %v302_v25  ;;  %v386_v10 = vld [vmem:[%s1030_s3 + $0x20] sm:$0xff] }
  0x46   :  { %v313_v37 = vmax.f32 %v311_v22, %v312_v29  ;;  %v340_v38 = vsel %vm264_vm0, %v339_v31, -inf  ;;  %v334_v42 = vrot.slane %v333_v30, 1  ;;  %v650_v49 = vmov 0  }
  0x47   :  { %626 = vmatpush.msk.msra.mxu2 %vm369_vm3, %v368_v33  ;;  %627 = vmatpush.msk.msra.mxu3 %vm369_vm3, %v368_v33  ;;  %v323_v14 = vrot.slane %v322_v35, 1  ;;  %v341_v40 = vrot.slane %v340_v38, 4  ;;  %v350_v41 = vmax.f32 %v349_v36, %v348_v32  ;;  %vm378_vm7 = vcmask 1045504  }
  0x48   :  { %616 = vmatpush.msk.msra.mxu0 %vm369_vm3, %v368_v33  ;;  %v373_v48 = vsel %vm264_vm0, %v372_v39, %v313_v37  ;;  %633 = vset.pattern.permute.xlu1 %v650_v49  ;;  %v335_v52 = vmax.f32 %v333_v30, %v334_v42  ;;  %vm380_vm8 = vcmask 1046528   ;;  %vm438_vm9 = vcmask 72704  }
  0x49   :  { %v324_v44 = vmax.f32 %v322_v35, %v323_v14  ;;  %v342_v45 = vmax.f32 %v340_v38, %v341_v40  ;;  %v351_v46 = vsel %vm277_vm1, %v350_v41, -inf  ;;  %632 = vset.pattern.permute.xlu0 %v650_v49  ;;  %425 = vperm.xlu1 %633, %v395_v43   ;;  %vm522_vm10 = vcmask 523264  }
  0x4a   :  { %v352_v47 = vrot.slane %v351_v46, 4  ;;  %435 = vperm.xlu0 %632, %v397_v15   ;;  %634 = vset.pattern.permute.xlu2 %v650_v49 }
  0x4b   :  { %v343_v51 = vrot.slane %v342_v45, 2  ;;  %v375_v55 = vsel %vm374_vm5, %v373_v48, %v324_v44  ;;  %415 = vperm.xlu2 %634, %v393_v50  }
  0x4c   :  { %v353_v53 = vmax.f32 %v351_v46, %v352_v47  ;;  %v377_v59 = vsel %vm376_vm6, %v375_v55, %v335_v52  ;;  %v515_v47 = vld [vmem:[%s1032_s5] sm:$0x3] }
  0x4d   :  { %v344_v54 = vmax.f32 %v342_v45, %v343_v51 }
  0x4e   :  { %v354_v56 = vrot.slane %v353_v53, 2 }
  0x4f   :  { %v345_v57 = vrot.slane %v344_v54, 1 }
  0x50   :  { %v355_v58 = vmax.f32 %v353_v53, %v354_v56 }
  0x51   :  { %v346_v62 = vmax.f32 %v344_v54, %v345_v57  ;;  %420 = vperm.xlu1 %633, %v394_v61  }
  0x52   :  { %v356_v63 = vrot.slane %v355_v58, 1  ;;  %430 = vperm.xlu0 %632, %v396_v60  }
  0x53   :  { %v379_v1 = vsel %vm378_vm7, %v377_v59, %v346_v62  ;;  %410 = vperm.xlu2 %634, %v392_v0  }
  0x54   :  { %v357_v2 = vmax.f32 %v355_v58, %v356_v63 }
  0x56   :  { %v381_v5 = vsel %vm380_vm8, %v379_v1, %v357_v2 }
  0x57   :  { %628 = vmatpush.msra.mxu2 %v381_v5  ;;  %629 = vmatpush.msra.mxu3 %v381_v5 }
  0x58   :  { %620 = vmatmul.msk.f32.vlgmr.msra.gmra.mxu2 %vm438_vm9, %v385_v3  ;;  %623 = vmatmul.msk.f32.vlgmr.msra.gmra.mxu3 %vm438_vm9, %v388_v4 }
  0x59   :  { %481 = vmatpush.msra.mxu0 %v381_v5  ;;  %400 = vperm.xlu1 %633, %v390_v8  }
  0x5a   :  { %617 = vmatmul.msk.f32.vlgmr.msra.gmra.mxu0 %vm438_vm9, %v382_v6  ;;  %405 = vperm.xlu0 %632, %v391_v7  }
  0x5b   :  { %519 = vperm.xlu2 %634, %v516_v9  }
  0x60   :  { %621 = vmatmul.msk.f32.gmra.mxu2 %vm438_vm9, %v386_v10  ;;  %624 = vmatmul.msk.f32.gmra.mxu3 %vm438_vm9, %v389_v11 }
  0x62   :  { %618 = vmatmul.msk.f32.gmra.mxu0 %vm438_vm9, %v383_v12 }
  0x68   :  { %622 = vmatmul.msk.f32.gmra.mxu2 %vm438_vm9, %v387_v13 }
  0x6a   :  { %619 = vmatmul.msk.f32.gmra.mxu0 %vm438_vm9, %v384_v16 }
  0xa5   :  { %v416_v27 = vpop.permute.xlu2 %415 }
  0xad   :  { %v411_v38 = vpop.permute.xlu2 %410 }
  0xb5   :  { %v520_v48 = vpop.permute.xlu2 %519 }
  0xbb   :  { %v426_v34 = vpop.permute.xlu1 %425 }
  0xbc   :  { %v436_v17 = vpop.permute.xlu0 %435 }
  0xc3   :  { %v421_v29 = vpop.permute.xlu1 %420 }
  0xc4   :  { %v431_v21 = vpop.permute.xlu0 %430 }
  0xcb   :  { %v401_v41 = vpop.permute.xlu1 %400 }
  0xcc   :  { %v406_v39 = vpop.permute.xlu0 %405 }
  0xd7   :  { %v483_v18 = vpop.f32.mrf.mxu0 }
  0xd8   :  { %v484_v43 = vadd.f32 %v483_v18, %v401_v41 }
  0xda   :  { %v507_v46 = vmax.f32 %v484_v43, 0.0 }
  0xdb   :  { %v492_v19 = vpop.f32.mrf.mxu2  ;;  %v501_v20 = vpop.f32.mrf.mxu3 }
  0xdc   :  { %v502_v25 = vadd.f32 %v501_v20, %v431_v21  ;;  %v493_v36 = vadd.f32 %v492_v19, %v416_v27 }
  0xde   :  { %v513_v30 = vmax.f32 %v502_v25, 0.0  ;;  %v510_v42 = vmax.f32 %v493_v36, 0.0 }
  0xdf   :  { %v486_v22 = vpop.f32.mrf.mxu0 }
  0xe0   :  { %v487_v15 = vadd.f32 %v486_v22, %v406_v39 }
  0xe2   :  { %v508_v45 = vmax.f32 %v487_v15, 0.0 }
  0xe3   :  { %v495_v23 = vpop.f32.mrf.mxu2  ;;  %v504_v24 = vpop.f32.mrf.mxu3 }
  0xe4   :  { %v505_v26 = vadd.f32 %v504_v24, %v436_v17  ;;  %v496_v32 = vadd.f32 %v495_v23, %v421_v29 }
  0xe6   :  { %v514_v28 = vmax.f32 %v505_v26, 0.0  ;;  %v511_v14 = vmax.f32 %v496_v32, 0.0 }
  0xe7   :  { %v489_v35 = vpop.f32.mrf.mxu0 }
  0xe8   :  { %534 = vmatpush.msra.mxu1 %v514_v28  ;;  %v490_v40 = vadd.f32 %v489_v35, %v411_v38 }
  0xea   :  { %535 = vmatpush.msra.mxu1 %v513_v30  ;;  %v509_v44 = vmax.f32 %v490_v40, 0.0 }
  0xeb   :  { %v498_v31 = vpop.f32.mrf.mxu2 }
  0xec   :  { %v499_v33 = vadd.f32 %v498_v31, %v426_v34 }
  0xee   :  { %v512_v37 = vmax.f32 %v499_v33, 0.0 }
  0xf0   :  { %536 = vmatpush.msra.mxu1 %v512_v37 }
  0xf2   :  { %537 = vmatpush.msra.mxu1 %v511_v14 }
  0xf4   :  { %538 = vmatpush.msra.mxu1 %v510_v42 }
  0xf6   :  { %539 = vmatpush.msra.mxu1 %v509_v44 }
  0xf8   :  { %540 = vmatpush.msra.mxu1 %v508_v45 }
  0xfa   :  { %541 = vmatpush.msra.mxu1 %v507_v46 }
  0xfb   :  { %625 = vmatmul.msk.f32.vlgmr.msra.gmra.mxu1 %vm522_vm10, %v515_v47 }
 0x178   :  { %v543_v49 = vpop.f32.mrf.mxu1 }
 0x179   :  { %v544_v50 = vadd.f32 %v543_v49, %v520_v48 }
 0x17b   :  { %546 = vst [vmem:[%s1034_s7] sm:$0x3] %v544_v50 }
 0x17c   :  { %551 = vsyncpa [#allocation4], 1 }

</bundles_post_ra>
